<compile_context>
chip_gen: v7x
topology: tpu7x:2x2x1
jax: 0.10.0
libtpu: 0.0.40
codegen_flags: <defaults>
</compile_context>

<pallas_src>
import functools

import jax
import jax.numpy as jnp
from jax.experimental import pallas as pl
from jax.experimental.pallas import tpu as pltpu

LANES = 128


def _round_up(x, m):
    return (x + m - 1) // m * m


def _tb_cap():
    """Batch-tile cap: 128 rows for the 128-wide MXU generations (<= v5),
    256 rows for the 256-wide MXU on v6e / v7x."""
    try:
        kind = jax.devices()[0].device_kind.lower()
    except Exception:
        return 256
    for tag in ("v2", "v3", "v4", "v5"):
        if tag in kind:
            return 128
    return 256


# ---------------------------------------------------------------------------
# Shared epilogue: bias + ReLU, fused value/logit head, deterministic
# Categorical (argmax) with simplified softmax algebra.
#   logp(argmax) = -log(s)                  (z at the max is exactly 0)
#   entropy      = log(s) - sum(e * z) / s  (exact, no approx reciprocal)
# ---------------------------------------------------------------------------
def _policy_epilogue(acc, b1_ref, wh_ref, bh_ref, out_ref, num_actions):
    h = jnp.maximum(acc + b1_ref[...], 0.0)                    # [TB, Hp] f32

    # fused heads: one lane-dense matmul -> [TB, 128]
    heads = (jnp.dot(h.astype(jnp.bfloat16), wh_ref[...],
                     preferred_element_type=jnp.float32)
             + bh_ref[...])

    tb = heads.shape[0]
    col = jax.lax.broadcasted_iota(jnp.int32, (tb, LANES), 1)
    valid = jnp.logical_and(col >= 1, col < 1 + num_actions)

    value = heads[:, 0:1]                                      # [TB, 1]
    logits = jnp.where(valid, heads, -1e30)

    m = jnp.max(logits, axis=-1, keepdims=True)
    z = logits - m
    e = jnp.exp(z)
    s = jnp.sum(e, axis=-1, keepdims=True)                     # [TB, 1]
    log_s = jnp.log(s)

    logp = -log_s                                              # logp of argmax
    ez = jnp.sum(jnp.where(valid, e * z, 0.0), axis=-1, keepdims=True)
    ent = log_s - ez / s                                       # exact entropy

    # first occurrence of the max (z == 0 exactly there) -> torch argmax ties
    ids = col - 1
    is_max = jnp.logical_and(z == 0.0, valid)
    action = jnp.min(jnp.where(is_max, ids, LANES), axis=-1, keepdims=True)

    # Pack the four per-row scalars into one lane-dense [TB, 128] f32 slab.
    # NOTE: action is carried as f32 -> exact only for num_actions < 2**24
    # (asserted in the wrapper); kept to preserve the single lane-dense store.
    out_ref[...] = jnp.where(
        col == 0, value,
        jnp.where(col == 1, logp,
                  jnp.where(col == 2, action.astype(jnp.float32),
                            jnp.where(col == 3, ent, 0.0))))


# ---------------------------------------------------------------------------
# Resident kernel (common path): weights fully VMEM-resident, grid = batch
# tiles only.  No accumulator scratch, no pl.when gating.
# ---------------------------------------------------------------------------
def ff_policy_resident_kernel(xs_ref, xt_ref, w1s_ref, w1t_ref, b1_ref,
                              wh_ref, bh_ref, out_ref, *, num_actions):
    acc = (jnp.dot(xs_ref[...], w1s_ref[...], preferred_element_type=jnp.float32)
           + jnp.dot(xt_ref[...], w1t_ref[...], preferred_element_type=jnp.float32))
    _policy_epilogue(acc, b1_ref, wh_ref, bh_ref, out_ref, num_actions)


# ---------------------------------------------------------------------------
# K-tiled fallback (very large Din): grid = (batch tiles, K tiles), resident
# f32 accumulator, per-stream K extents.
# ---------------------------------------------------------------------------
def ff_policy_tiled_kernel(xs_ref, xt_ref, w1s_ref, w1t_ref, b1_ref,
                           wh_ref, bh_ref, out_ref, acc_ref,
                           *, num_actions, nk_s, nk_t):
    k = pl.program_id(1)
    nk = max(nk_s, nk_t)

    @pl.when(k == 0)
    def _():
        acc_ref[...] = jnp.zeros_like(acc_ref)

    def scene_dot():
        acc_ref[...] += jnp.dot(xs_ref[...], w1s_ref[...],
                                preferred_element_type=jnp.float32)

    def target_dot():
        acc_ref[...] += jnp.dot(xt_ref[...], w1t_ref[...],
                                preferred_element_type=jnp.float32)

    if nk_s == nk:
        scene_dot()
    else:
        pl.when(k < nk_s)(scene_dot)
    if nk_t == nk:
        target_dot()
    else:
        pl.when(k < nk_t)(target_dot)

    @pl.when(k == nk - 1)
    def _():
        _policy_epilogue(acc_ref[...], b1_ref, wh_ref, bh_ref, out_ref,
                         num_actions)


def ff_policy_act(scene_imgs, target_imgs, states, masks, params):
    """Pallas implementation of FFPolicy.act (deterministic=True path)."""
    del masks  # non-recurrent feed-forward policy: masks unused

    B = scene_imgs.shape[0]
    xs = scene_imgs.reshape(B, -1)
    xt = target_imgs.reshape(B, -1)

    w1, b1, wv, bv, wa, ba = params
    K1, K2 = xs.shape[1], xt.shape[1]
    Din, H = w1.shape
    A = wa.shape[1]
    assert K1 + K2 == Din and 1 + A <= LANES and A < (1 << 24)

    # split trunk weights -> no HBM concat of x needed
    w1s, w1t = w1[:K1], w1[K1:]

    f32, bf16 = jnp.float32, jnp.bfloat16

    # ---- tile derivation -------------------------------------------------
    cap = _tb_cap()                       # 128 (<=v5) / 256 (v6e, v7x)
    if B >= 16:
        # >=2 "parallel" batch tiles whenever B permits, so multi-TensorCore
        # chips (v7x) can shard the batch axis.
        TB = min(cap, _round_up((B + 1) // 2, 8))
    else:
        TB = _round_up(max(B, 1), 8)
    Bp = _round_up(B, TB)
    Hp = _round_up(H, LANES)              # hidden padded to lane width

    # Per-stream K padding (shorter stream is NOT padded up to the longer).
    Kp1 = _round_up(K1, LANES)
    Kp2 = _round_up(K2, LANES)

    # Resident path: full-K weight blocks with constant block index are DMA'd
    # once for the whole grid; no K axis, no acc scratch.  Budget kept well
    # under v5e's 16 MiB scoped-VMEM default (v6e 32 MiB, v7x 32/64 MiB).
    resident_bytes = (
        2 * TB * (Kp1 + Kp2) * 2              # xs/xt, double-buffered bf16
        + 2 * (Kp1 + Kp2) * Hp * 2            # w1 halves (conservative 2x)
        + 2 * TB * LANES * 4                  # output slab, double-buffered
        + 2 * (Hp * LANES * 2 + (Hp + 2 * LANES) * 4))  # head W + biases
    use_resident = resident_bytes <= 12 * 1024 * 1024

    def pad2(a, rows, cols):
        return jnp.pad(a, ((0, rows - a.shape[0]), (0, cols - a.shape[1])))

    # fused head: column 0 = value head, columns 1..A = action logits
    wh = pad2(jnp.concatenate([wv, wa], axis=1).astype(bf16), Hp, LANES)
    bh = pad2(jnp.concatenate([bv, ba], axis=1).astype(f32), 1, LANES)
    b1_p = pad2(b1.astype(f32), 1, Hp)

    if use_resident:
        xs_p = pad2(xs.astype(bf16), Bp, Kp1)      # cast BEFORE padding
        xt_p = pad2(xt.astype(bf16), Bp, Kp2)
        w1s_p = pad2(w1s.astype(bf16), Kp1, Hp)
        w1t_p = pad2(w1t.astype(bf16), Kp2, Hp)

        kernel = functools.partial(ff_policy_resident_kernel, num_actions=A)
        out = pl.pallas_call(
            kernel,
            out_shape=jax.ShapeDtypeStruct((Bp, LANES), f32),
            grid_spec=pltpu.PrefetchScalarGridSpec(
                num_scalar_prefetch=0,
                grid=(Bp // TB,),
                in_specs=[
                    pl.BlockSpec((TB, Kp1), lambda b: (b, 0)),     # xs
                    pl.BlockSpec((TB, Kp2), lambda b: (b, 0)),     # xt
                    pl.BlockSpec((Kp1, Hp), lambda b: (0, 0)),     # w1 scene
                    pl.BlockSpec((Kp2, Hp), lambda b: (0, 0)),     # w1 target
                    pl.BlockSpec((1, Hp), lambda b: (0, 0)),       # b1
                    pl.BlockSpec((Hp, LANES), lambda b: (0, 0)),   # head W
                    pl.BlockSpec((1, LANES), lambda b: (0, 0)),    # head b
                ],
                out_specs=pl.BlockSpec((TB, LANES), lambda b: (b, 0)),
            ),
            compiler_params=pltpu.CompilerParams(
                dimension_semantics=("parallel",)),
        )(xs_p, xt_p, w1s_p, w1t_p, b1_p, wh, bh)
    else:
        # K-tiled fallback for very large Din.
        TK = 2048
        Kp1t = _round_up(K1, TK)
        Kp2t = _round_up(K2, TK)
        nk_s, nk_t = Kp1t // TK, Kp2t // TK
        nk = max(nk_s, nk_t)

        xs_p = pad2(xs.astype(bf16), Bp, Kp1t)
        xt_p = pad2(xt.astype(bf16), Bp, Kp2t)
        w1s_p = pad2(w1s.astype(bf16), Kp1t, Hp)
        w1t_p = pad2(w1t.astype(bf16), Kp2t, Hp)

        kernel = functools.partial(ff_policy_tiled_kernel, num_actions=A,
                                   nk_s=nk_s, nk_t=nk_t)
        out = pl.pallas_call(
            kernel,
            out_shape=jax.ShapeDtypeStruct((Bp, LANES), f32),
            grid_spec=pltpu.PrefetchScalarGridSpec(
                num_scalar_prefetch=0,
                grid=(Bp // TB, nk),
                in_specs=[
                    pl.BlockSpec((TB, TK),
                                 lambda b, k: (b, jnp.minimum(k, nk_s - 1))),
                    pl.BlockSpec((TB, TK),
                                 lambda b, k: (b, jnp.minimum(k, nk_t - 1))),
                    pl.BlockSpec((TK, Hp),
                                 lambda b, k: (jnp.minimum(k, nk_s - 1), 0)),
                    pl.BlockSpec((TK, Hp),
                                 lambda b, k: (jnp.minimum(k, nk_t - 1), 0)),
                    pl.BlockSpec((1, Hp), lambda b, k: (0, 0)),
                    pl.BlockSpec((Hp, LANES), lambda b, k: (0, 0)),
                    pl.BlockSpec((1, LANES), lambda b, k: (0, 0)),
                ],
                out_specs=pl.BlockSpec((TB, LANES), lambda b, k: (b, 0)),
                scratch_shapes=[pltpu.VMEM((TB, Hp), jnp.float32)],
            ),
            compiler_params=pltpu.CompilerParams(
                dimension_semantics=("parallel", "arbitrary"),
                vmem_limit_bytes=32 * 1024 * 1024),
        )(xs_p, xt_p, w1s_p, w1t_p, b1_p, wh, bh)

    # unpack lane-dense slab in the wrapper (free layout plumbing)
    value = out[:B, 0:1]
    logp = out[:B, 1:2]
    action = jnp.round(out[:B, 2:3]).astype(jnp.int32)
    entropy = jnp.mean(out[:B, 3])

    # TODO(synk): evaluate_actions() additionally needs hidden features /
    # log-probs of arbitrary actions; the act() hot path does not return x.
    return value, action, logp, states, entropy


def _reference(scene_imgs, target_imgs, params):
    """Plain-JAX reference (same bf16-operand / f32-accumulate matmul path)."""
    w1, b1, wv, bv, wa, ba = params
    B = scene_imgs.shape[0]
    bf16 = jnp.bfloat16
    x = jnp.concatenate(
        [scene_imgs.reshape(B, -1), target_imgs.reshape(B, -1)], axis=-1)
    h = jnp.maximum(
        jnp.dot(x.astype(bf16), w1.astype(bf16),
                preferred_element_type=jnp.float32) + b1, 0.0)
    wh = jnp.concatenate([wv, wa], axis=1)
    bh = jnp.concatenate([bv, ba], axis=1)
    heads = jnp.dot(h.astype(bf16), wh.astype(bf16),
                    preferred_element_type=jnp.float32) + bh
    value = heads[:, 0:1]
    logits = heads[:, 1:]
    log_probs = jax.nn.log_softmax(logits, axis=-1)
    probs = jax.nn.softmax(logits, axis=-1)
    action = jnp.argmax(logits, axis=-1, keepdims=True).astype(jnp.int32)
    logp = jnp.take_along_axis(log_probs, action, axis=-1)
    entropy = jnp.mean(-jnp.sum(probs * log_probs, axis=-1))
    return value, action, logp, entropy


if __name__ == "__main__":
    key = jax.random.PRNGKey(0)
    k_scene, k_target, k_w1, k_wv, k_wa = jax.random.split(key, 5)

    # Small shapes consistent with the interface: NCHW images, batch=2.
    B, C, Himg, Wimg = 2, 4, 16, 16
    hidden_dim, num_actions = 32, 4
    Din = 2 * C * Himg * Wimg

    scene_imgs = jax.random.normal(k_scene, (B, C, Himg, Wimg), jnp.float32)
    target_imgs = jax.random.normal(k_target, (B, C, Himg, Wimg), jnp.float32)
    states = jnp.zeros((B, 1), jnp.float32)
    masks = jnp.ones((B, 1), jnp.float32)

    # Deterministic synthetic parameters (no checkpoint loading).
    w1 = jax.random.normal(k_w1, (Din, hidden_dim), jnp.float32) * 0.02
    b1 = jnp.zeros((1, hidden_dim), jnp.float32)
    wv = jax.random.normal(k_wv, (hidden_dim, 1), jnp.float32) * 0.1
    bv = jnp.zeros((1, 1), jnp.float32)
    wa = jax.random.normal(k_wa, (hidden_dim, num_actions), jnp.float32) * 0.1
    ba = jnp.zeros((1, num_actions), jnp.float32)
    params = (w1, b1, wv, bv, wa, ba)

    value, action, logp, states_out, entropy = jax.block_until_ready(
        ff_policy_act(scene_imgs, target_imgs, states, masks, params))

    ref_value, ref_action, ref_logp, ref_entropy = _reference(
        scene_imgs, target_imgs, params)

    assert jnp.allclose(value, ref_value, atol=2e-3, rtol=2e-3)
    assert jnp.array_equal(action, ref_action)
    assert jnp.allclose(logp, ref_logp, atol=2e-3, rtol=2e-3)
    assert jnp.allclose(entropy, ref_entropy, atol=2e-3)

    print("KERNEL_OK")
</pallas_src>

<mosaic_0001>
module attributes {stable_mosaic.version = 11 : i64} {
  func.func @ff_policy_resident_kernel(%arg0: i32, %arg1: memref<8x1024xbf16, #tpu.memory_space<vmem>>, %arg2: memref<8x1024xbf16, #tpu.memory_space<vmem>>, %arg3: memref<1024x128xbf16, #tpu.memory_space<vmem>>, %arg4: memref<1024x128xbf16, #tpu.memory_space<vmem>>, %arg5: memref<1x128xf32, #tpu.memory_space<vmem>>, %arg6: memref<128x128xbf16, #tpu.memory_space<vmem>>, %arg7: memref<1x128xf32, #tpu.memory_space<vmem>>, %arg8: memref<8x128xf32, #tpu.memory_space<vmem>>) attributes {dimension_semantics = [#tpu.dimension_semantics<parallel>], iteration_bounds = array<i64: 1>, scalar_prefetch = 0 : i64, scratch_operands = 0 : i64, tpu.core_type = #tpu.core_type<tc>, window_params = [{transform_indices = @transform_0, window_bounds = array<i64: 8, 1024>}, {transform_indices = @transform_1, window_bounds = array<i64: 8, 1024>}, {pipeline_mode = #tpu.pipeline_mode<synchronous>, transform_indices = @transform_2, window_bounds = array<i64: 1024, 128>}, {pipeline_mode = #tpu.pipeline_mode<synchronous>, transform_indices = @transform_3, window_bounds = array<i64: 1024, 128>}, {pipeline_mode = #tpu.pipeline_mode<synchronous>, transform_indices = @transform_4, window_bounds = array<i64: 1, 128>}, {pipeline_mode = #tpu.pipeline_mode<synchronous>, transform_indices = @transform_5, window_bounds = array<i64: 128, 128>}, {pipeline_mode = #tpu.pipeline_mode<synchronous>, transform_indices = @transform_6, window_bounds = array<i64: 1, 128>}, {transform_indices = @transform_7, window_bounds = array<i64: 8, 128>}]} {
    %c0 = arith.constant 0 : index
    %c0_0 = arith.constant 0 : index
    %0 = vector.load %arg1[%c0, %c0_0] : memref<8x1024xbf16, #tpu.memory_space<vmem>>, vector<8x1024xbf16>
    %c0_1 = arith.constant 0 : index
    %c0_2 = arith.constant 0 : index
    %1 = vector.load %arg3[%c0_1, %c0_2] : memref<1024x128xbf16, #tpu.memory_space<vmem>>, vector<1024x128xbf16>
    %cst = arith.constant dense<0.000000e+00> : vector<8x128xf32>
    %2 = tpu.matmul %0, %1, %cst {dimension_numbers = #tpu.dot_dimension_numbers<[1], [0], [0], [1], [0, 0, 1, 1], [], []>} : vector<8x1024xbf16>, vector<1024x128xbf16>, vector<8x128xf32> -> vector<8x128xf32>
    %c0_3 = arith.constant 0 : index
    %c0_4 = arith.constant 0 : index
    %3 = vector.load %arg2[%c0_3, %c0_4] : memref<8x1024xbf16, #tpu.memory_space<vmem>>, vector<8x1024xbf16>
    %c0_5 = arith.constant 0 : index
    %c0_6 = arith.constant 0 : index
    %4 = vector.load %arg4[%c0_5, %c0_6] : memref<1024x128xbf16, #tpu.memory_space<vmem>>, vector<1024x128xbf16>
    %cst_7 = arith.constant dense<0.000000e+00> : vector<8x128xf32>
    %5 = tpu.matmul %3, %4, %cst_7 {dimension_numbers = #tpu.dot_dimension_numbers<[1], [0], [0], [1], [0, 0, 1, 1], [], []>} : vector<8x1024xbf16>, vector<1024x128xbf16>, vector<8x128xf32> -> vector<8x128xf32>
    %6 = arith.addf %2, %5 : vector<8x128xf32>
    %c0_8 = arith.constant 0 : index
    %c0_9 = arith.constant 0 : index
    %7 = vector.load %arg5[%c0_8, %c0_9] : memref<1x128xf32, #tpu.memory_space<vmem>>, vector<1x128xf32>
    %8 = vector.broadcast %7 : vector<1x128xf32> to vector<8x128xf32>
    %9 = arith.addf %6, %8 : vector<8x128xf32>
    %cst_10 = arith.constant 0.000000e+00 : f32
    %10 = vector.broadcast %cst_10 : f32 to vector<8x128xf32>
    %11 = arith.maximumf %9, %10 : vector<8x128xf32>
    %12 = arith.truncf %11 : vector<8x128xf32> to vector<8x128xbf16>
    %c0_11 = arith.constant 0 : index
    %c0_12 = arith.constant 0 : index
    %13 = vector.load %arg6[%c0_11, %c0_12] : memref<128x128xbf16, #tpu.memory_space<vmem>>, vector<128x128xbf16>
    %cst_13 = arith.constant dense<0.000000e+00> : vector<8x128xf32>
    %14 = tpu.matmul %12, %13, %cst_13 {dimension_numbers = #tpu.dot_dimension_numbers<[1], [0], [0], [1], [0, 0, 1, 1], [], []>} : vector<8x128xbf16>, vector<128x128xbf16>, vector<8x128xf32> -> vector<8x128xf32>
    %c0_14 = arith.constant 0 : index
    %c0_15 = arith.constant 0 : index
    %15 = vector.load %arg7[%c0_14, %c0_15] : memref<1x128xf32, #tpu.memory_space<vmem>>, vector<1x128xf32>
    %16 = vector.broadcast %15 : vector<1x128xf32> to vector<8x128xf32>
    %17 = arith.addf %14, %16 : vector<8x128xf32>
    %18 = tpu.iota {dimensions = array<i32: 1>} : vector<8x128xi32>
    %c1_i32 = arith.constant 1 : i32
    %19 = vector.broadcast %c1_i32 : i32 to vector<8x128xi32>
    %20 = arith.cmpi sge, %18, %19 : vector<8x128xi32>
    %c5_i32 = arith.constant 5 : i32
    %21 = vector.broadcast %c5_i32 : i32 to vector<8x128xi32>
    %22 = arith.cmpi slt, %18, %21 : vector<8x128xi32>
    %23 = arith.andi %20, %22 : vector<8x128xi1>
    %24 = vector.extract_strided_slice %17 {offsets = [0, 0], sizes = [8, 1], strides = [1, 1]} : vector<8x128xf32> to vector<8x1xf32>
    %cst_16 = arith.constant -1.000000e+30 : f32
    %25 = vector.broadcast %cst_16 : f32 to vector<8x128xf32>
    %26 = arith.select %23, %17, %25 : vector<8x128xi1>, vector<8x128xf32>
    %cst_17 = arith.constant dense<0xFF800000> : vector<8xf32>
    %27 = vector.multi_reduction <maximumf>, %26, %cst_17 [1] : vector<8x128xf32> to vector<8xf32>
    %28 = vector.shape_cast %27 : vector<8xf32> to vector<8x1xf32>
    %29 = vector.broadcast %28 : vector<8x1xf32> to vector<8x128xf32>
    %30 = arith.subf %26, %29 : vector<8x128xf32>
    %31 = math.exp %30 : vector<8x128xf32>
    %cst_18 = arith.constant dense<0.000000e+00> : vector<8xf32>
    %32 = vector.multi_reduction <add>, %31, %cst_18 [1] : vector<8x128xf32> to vector<8xf32>
    %33 = vector.shape_cast %32 : vector<8xf32> to vector<8x1xf32>
    %34 = math.log %33 : vector<8x1xf32>
    %cst_19 = arith.constant 0.000000e+00 : f32
    %35 = vector.broadcast %cst_19 : f32 to vector<8x1xf32>
    %36 = arith.subf %35, %34 : vector<8x1xf32>
    %37 = arith.mulf %31, %30 : vector<8x128xf32>
    %cst_20 = arith.constant 0.000000e+00 : f32
    %38 = vector.broadcast %cst_20 : f32 to vector<8x128xf32>
    %39 = arith.select %23, %37, %38 : vector<8x128xi1>, vector<8x128xf32>
    %cst_21 = arith.constant dense<0.000000e+00> : vector<8xf32>
    %40 = vector.multi_reduction <add>, %39, %cst_21 [1] : vector<8x128xf32> to vector<8xf32>
    %41 = vector.shape_cast %40 : vector<8xf32> to vector<8x1xf32>
    %42 = arith.divf %41, %33 : vector<8x1xf32>
    %43 = arith.subf %34, %42 : vector<8x1xf32>
    %c1_i32_22 = arith.constant 1 : i32
    %44 = vector.broadcast %c1_i32_22 : i32 to vector<8x128xi32>
    %45 = arith.subi %18, %44 : vector<8x128xi32>
    %cst_23 = arith.constant 0.000000e+00 : f32
    %46 = vector.broadcast %cst_23 : f32 to vector<8x128xf32>
    %47 = arith.cmpf oeq, %30, %46 : vector<8x128xf32>
    %48 = arith.andi %47, %23 : vector<8x128xi1>
    %c128_i32 = arith.constant 128 : i32
    %49 = vector.broadcast %c128_i32 : i32 to vector<8x128xi32>
    %50 = arith.select %48, %45, %49 : vector<8x128xi1>, vector<8x128xi32>
    %cst_24 = arith.constant dense<2147483647> : vector<8xi32>
    %51 = vector.multi_reduction <minsi>, %50, %cst_24 [1] : vector<8x128xi32> to vector<8xi32>
    %52 = vector.shape_cast %51 : vector<8xi32> to vector<8x1xi32>
    %c0_i32 = arith.constant 0 : i32
    %53 = vector.broadcast %c0_i32 : i32 to vector<8x128xi32>
    %54 = arith.cmpi eq, %18, %53 : vector<8x128xi32>
    %c1_i32_25 = arith.constant 1 : i32
    %55 = vector.broadcast %c1_i32_25 : i32 to vector<8x128xi32>
    %56 = arith.cmpi eq, %18, %55 : vector<8x128xi32>
    %c2_i32 = arith.constant 2 : i32
    %57 = vector.broadcast %c2_i32 : i32 to vector<8x128xi32>
    %58 = arith.cmpi eq, %18, %57 : vector<8x128xi32>
    %59 = arith.sitofp %52 : vector<8x1xi32> to vector<8x1xf32>
    %c3_i32 = arith.constant 3 : i32
    %60 = vector.broadcast %c3_i32 : i32 to vector<8x128xi32>
    %61 = arith.cmpi eq, %18, %60 : vector<8x128xi32>
    %cst_26 = arith.constant 0.000000e+00 : f32
    %62 = vector.shape_cast %43 : vector<8x1xf32> to vector<8x1xf32>
    %63 = vector.broadcast %62 : vector<8x1xf32> to vector<8x128xf32>
    %64 = vector.broadcast %cst_26 : f32 to vector<8x128xf32>
    %65 = arith.select %61, %63, %64 : vector<8x128xi1>, vector<8x128xf32>
    %66 = vector.shape_cast %59 : vector<8x1xf32> to vector<8x1xf32>
    %67 = vector.broadcast %66 : vector<8x1xf32> to vector<8x128xf32>
    %68 = arith.select %58, %67, %65 : vector<8x128xi1>, vector<8x128xf32>
    %69 = vector.shape_cast %36 : vector<8x1xf32> to vector<8x1xf32>
    %70 = vector.broadcast %69 : vector<8x1xf32> to vector<8x128xf32>
    %71 = arith.select %56, %70, %68 : vector<8x128xi1>, vector<8x128xf32>
    %72 = vector.shape_cast %24 : vector<8x1xf32> to vector<8x1xf32>
    %73 = vector.broadcast %72 : vector<8x1xf32> to vector<8x128xf32>
    %74 = arith.select %54, %73, %71 : vector<8x128xi1>, vector<8x128xf32>
    %c0_27 = arith.constant 0 : index
    %c0_28 = arith.constant 0 : index
    %75 = vector.load %arg8[%c0_27, %c0_28] : memref<8x128xf32, #tpu.memory_space<vmem>>, vector<8x128xf32>
    tpu.vector_store %arg8[%c0_27, %c0_28], %74 {strides = array<i32>} : memref<8x128xf32, #tpu.memory_space<vmem>>, vector<8x128xf32>,
    return
  }
  func.func @transform_0(%arg0: i32) -> (i32, i32) {
    %c0_i32 = arith.constant 0 : i32
    %c0_i32_0 = arith.constant 0 : i32
    return %arg0, %c0_i32 : i32, i32
  }
  func.func @transform_1(%arg0: i32) -> (i32, i32) {
    %c0_i32 = arith.constant 0 : i32
    %c0_i32_0 = arith.constant 0 : i32
    return %arg0, %c0_i32 : i32, i32
  }
  func.func @transform_2(%arg0: i32) -> (i32, i32) {
    %c0_i32 = arith.constant 0 : i32
    %c0_i32_0 = arith.constant 0 : i32
    %c0_i32_1 = arith.constant 0 : i32
    return %c0_i32, %c0_i32_0 : i32, i32
  }
  func.func @transform_3(%arg0: i32) -> (i32, i32) {
    %c0_i32 = arith.constant 0 : i32
    %c0_i32_0 = arith.constant 0 : i32
    %c0_i32_1 = arith.constant 0 : i32
    return %c0_i32, %c0_i32_0 : i32, i32
  }
  func.func @transform_4(%arg0: i32) -> (i32, i32) {
    %c0_i32 = arith.constant 0 : i32
    %c0_i32_0 = arith.constant 0 : i32
    %c0_i32_1 = arith.constant 0 : i32
    return %c0_i32, %c0_i32_0 : i32, i32
  }
  func.func @transform_5(%arg0: i32) -> (i32, i32) {
    %c0_i32 = arith.constant 0 : i32
    %c0_i32_0 = arith.constant 0 : i32
    %c0_i32_1 = arith.constant 0 : i32
    return %c0_i32, %c0_i32_0 : i32, i32
  }
  func.func @transform_6(%arg0: i32) -> (i32, i32) {
    %c0_i32 = arith.constant 0 : i32
    %c0_i32_0 = arith.constant 0 : i32
    %c0_i32_1 = arith.constant 0 : i32
    return %c0_i32, %c0_i32_0 : i32, i32
  }
  func.func @transform_7(%arg0: i32) -> (i32, i32) {
    %c0_i32 = arith.constant 0 : i32
    %c0_i32_0 = arith.constant 0 : i32
    return %arg0, %c0_i32 : i32, i32
  }
}

</mosaic_0001>

<bundles_post_ra>
// kernel: tpu_custom_call.1
= control target key start
LH: loop header
LB: loop body
LE: loop exit
PB: predicated region body
PF: predicated region fallthrough
CT: control target
= control target key end

     0   :  { %12 = vsyncpa [#allocation3], 0  ;;  %s2522_s0 = inlined_call_operand.hbm [shape: bf16[8,1024], index: 0, kind: input, shape index: {}]   ;;  %s2523_s1 = inlined_call_operand.hbm [shape: bf16[8,1024], index: 1, kind: input, shape index: {}]   ;;  %s2524_s2 = inlined_call_operand.hbm [shape: bf16[1024,128], index: 2, kind: input, shape index: {}]   ;;  %s2525_s3 = inlined_call_operand.hbm [shape: bf16[1024,128], index: 3, kind: input, shape index: {}]   ;;  %s2526_s4 = inlined_call_operand.vmem [shape: f32[1,128], index: 4, kind: input, shape index: {}]   ;;  %s2527_s5 = inlined_call_operand.hbm [shape: bf16[128,128], index: 5, kind: input, shape index: {}]   ;;  %s2528_s6 = inlined_call_operand.vmem [shape: f32[1,128], index: 6, kind: input, shape index: {}]   ;;  %s2529_s7 = inlined_call_operand.hbm [shape: f32[8,128], index: 7, kind: output, shape index: {}]  }
   0x1   :  { %13 = vsyncpa [#allocation6], 0 }
   0x2   :  { %14 = vsyncpa [#allocation9], 0 }
   0x3   :  { %15 = vsyncpa [#allocation4], 0  ;;  %s2365_s24 = smov [#allocation5]   ;;  %s2225_s28 = scalar_lea.hbm %s2523_s1, 512 }
   0x4   :  { %s32_s25 = sshll.u32 %s2365_s24, 4  ;;  %p2226_p0 = scmp.ne.s32.totalorder %s2523_s1, %s2225_s28  ;;  %s33_s25 = int_to_ptr.vmem [resolvable:$true] %s32_s25 }
   0x5   :  { %p2229_p1 = scmp.lt.u32.totalorder %s2225_s28, %s2523_s1 }
   0x7   :  { %p2231_p2 = pnand %p2229_p1, %p2226_p0 }
   0x9   :  { %2234 = shalt.err (!%p2231_p2)
}
   0xa   :  { %s2235_s10 = scalar_lea.vmem %s33_s25, 512  ;;  %p2240_p4 = scmp.lt.s32.totalorder %s33_s25, %s33_s25 }
   0xb   :  { %p2236_p3 = scmp.ne.s32.totalorder %s33_s25, %s2235_s10  ;;  %p2241_p5 = scmp.lt.s32.totalorder %s2235_s10, %s2235_s10 }
   0xd   :  { %p2242_p6 = por %p2241_p5, %p2240_p4 }
   0xf   :  { %p2243_p7 = pnand %p2242_p6, %p2236_p3 }
  0x11   :  { %2246 = shalt.err (!%p2243_p7)
}
  0x12   :  { %35 = dma.hbm_to_vmem [thread:$0]  %s2523_s1, 512, %s33_s25, [#allocation6]  }
  0x13   :  { %s2366_s13 = smov [#allocation8]   ;;  %s2367_s15 = smov [#allocation2]  }
  0x14   :  { %s53_s14 = sshll.u32 %s2366_s13, 4  ;;  %s22_s16 = sshll.u32 %s2367_s15, 4  ;;  %s54_s14 = int_to_ptr.vmem [resolvable:$true] %s53_s14  ;;  %s23_s16 = int_to_ptr.vmem [resolvable:$true] %s22_s16 }
  0x15   :  { %s2247_s19 = scalar_lea.hbm %s2525_s3, 8192 }
  0x16   :  { %p2248_p8 = scmp.ne.s32.totalorder %s2525_s3, %s2247_s19  ;;  %p2251_p9 = scmp.lt.u32.totalorder %s2247_s19, %s2525_s3 }
  0x18   :  { %p2253_p10 = pnand %p2251_p9, %p2248_p8 }
  0x1a   :  { %2256 = shalt.err (!%p2253_p10)
}
  0x1b   :  { %s2257_s1 = scalar_lea.vmem %s54_s14, 8192  ;;  %p2262_p12 = scmp.lt.s32.totalorder %s54_s14, %s54_s14 }
  0x1c   :  { %p2258_p11 = scmp.ne.s32.totalorder %s54_s14, %s2257_s1  ;;  %p2263_p13 = scmp.lt.s32.totalorder %s2257_s1, %s2257_s1 }
  0x1e   :  { %p2264_p0 = por %p2263_p13, %p2262_p12 }
  0x20   :  { %p2265_p1 = pnand %p2264_p0, %p2258_p11 }
  0x22   :  { %2268 = shalt.err (!%p2265_p1)
}
  0x23   :  { %s2368_s24 = smov 64   ;;  %s2369_s25 = smov 4  }
  0x24   :  { %59 = dma.hbm_to_vmem [thread:$0]  %s2525_s3, 8192, %s54_s14, [#allocation9], %s2368_s24, %s2368_s24, %s2369_s25  }
  0x25   :  { %s2269_s30 = scalar_lea.hbm %s2522_s0, 512 }
  0x26   :  { %p2270_p2 = scmp.ne.s32.totalorder %s2522_s0, %s2269_s30  ;;  %p2273_p3 = scmp.lt.u32.totalorder %s2269_s30, %s2522_s0 }
  0x28   :  { %p2275_p4 = pnand %p2273_p3, %p2270_p2 }
  0x2a   :  { %2278 = shalt.err (!%p2275_p4)
}
  0x2b   :  { %s2279_s12 = scalar_lea.vmem %s23_s16, 512  ;;  %p2284_p6 = scmp.lt.s32.totalorder %s23_s16, %s23_s16 }
  0x2c   :  { %p2280_p5 = scmp.ne.s32.totalorder %s23_s16, %s2279_s12  ;;  %p2285_p7 = scmp.lt.s32.totalorder %s2279_s12, %s2279_s12 }
  0x2e   :  { %p2286_p8 = por %p2285_p7, %p2284_p6 }
  0x30   :  { %p2287_p9 = pnand %p2286_p8, %p2280_p5 }
  0x32   :  { %2290 = shalt.err (!%p2287_p9)
}
  0x33   :  { %25 = dma.hbm_to_vmem [thread:$0]  %s2522_s0, 512, %s23_s16, [#allocation3]  }
  0x34   :  { %s2370_s14 = smov [#allocation7]   ;;  %s2371_s17 = smov [#allocation10]  }
  0x35   :  { %s41_s15 = sshll.u32 %s2370_s14, 4  ;;  %s67_s18 = sshll.u32 %s2371_s17, 4  ;;  %s42_s15 = int_to_ptr.vmem [resolvable:$true] %s41_s15  ;;  %s68_s18 = int_to_ptr.vmem [resolvable:$true] %s67_s18 }
  0x36   :  { %s2291_s21 = scalar_lea.hbm %s2524_s2, 8192 }
  0x37   :  { %p2292_p10 = scmp.ne.s32.totalorder %s2524_s2, %s2291_s21  ;;  %p2295_p11 = scmp.lt.u32.totalorder %s2291_s21, %s2524_s2 }
  0x39   :  { %p2297_p12 = pnand %p2295_p11, %p2292_p10 }
  0x3b   :  { %2300 = shalt.err (!%p2297_p12)
}
  0x3c   :  { %s2301_s0 = scalar_lea.vmem %s42_s15, 8192  ;;  %p2306_p0 = scmp.lt.s32.totalorder %s42_s15, %s42_s15 }
  0x3d   :  { %p2302_p13 = scmp.ne.s32.totalorder %s42_s15, %s2301_s0  ;;  %p2307_p1 = scmp.lt.s32.totalorder %s2301_s0, %s2301_s0 }
  0x3f   :  { %p2308_p2 = por %p2307_p1, %p2306_p0 }
  0x41   :  { %p2309_p3 = pnand %p2308_p2, %p2302_p13 }
  0x43   :  { %2312 = shalt.err (!%p2309_p3)
}
  0x44   :  { %47 = dma.hbm_to_vmem [thread:$0]  %s2524_s2, 8192, %s42_s15, [#allocation6], %s2368_s24, %s2368_s24, %s2369_s25  }
  0x45   :  { %s2313_s30 = scalar_lea.hbm %s2527_s5, 1024 }
  0x46   :  { %p2314_p4 = scmp.ne.s32.totalorder %s2527_s5, %s2313_s30  ;;  %p2317_p5 = scmp.lt.u32.totalorder %s2313_s30, %s2527_s5 }
  0x48   :  { %p2319_p6 = pnand %p2317_p5, %p2314_p4 }
  0x4a   :  { %2322 = shalt.err (!%p2319_p6)
}
  0x4b   :  { %s2323_s12 = scalar_lea.vmem %s68_s18, 1024  ;;  %p2328_p8 = scmp.lt.s32.totalorder %s68_s18, %s68_s18 }
  0x4c   :  { %p2324_p7 = scmp.ne.s32.totalorder %s68_s18, %s2323_s12  ;;  %p2329_p9 = scmp.lt.s32.totalorder %s2323_s12, %s2323_s12 }
  0x4e   :  { %p2330_p10 = por %p2329_p9, %p2328_p8 }
  0x50   :  { %p2331_p11 = pnand %p2330_p10, %p2324_p7 }
  0x52   :  { %2334 = shalt.err (!%p2331_p11)
}
  0x53   :  { %73 = dma.hbm_to_vmem [thread:$0]  %s2527_s5, 1024, %s68_s18, [#allocation9], %s2368_s24, %s2368_s24, %s2369_s25  }
  0x54   :  { %2357 = dma.done.wait [#allocation3], 512  }
  0x55   :  { %2358 = vsyncadd [#allocation3], 4294966784 }
  0x56   :  { %2359 = dma.done.wait [#allocation6], 8704  }
  0x57   :  { %2360 = vsyncadd [#allocation6], 4294958592 }
  0x58   :  { %2361 = dma.done.wait [#allocation9], 9216  }
  0x59   :  { %2362 = vsyncadd [#allocation9], 4294958080  ;;  %v2067_v0 = vld [vmem:[#allocation8 + $0x40] sm:$0xff]   ;;  %v2071_v4 = vld [vmem:[#allocation8 + $0x48] sm:$0xff]   ;;  %vm2373_vm0 = vmmov 0  }
  0x5a   :  { %v2068_v1 = vld [vmem:[#allocation8 + $0xc0] sm:$0xff]   ;;  %1849 = vmatprep.subr.bf16.mxu0 %v2067_v0  ;;  %v2072_v5 = vld [vmem:[#allocation8 + $0xc8] sm:$0xff]   ;;  %v2075_v8 = vld [vmem:[#allocation8 + $0x50] sm:$0xff]  }
  0x5b   :  { %v2069_v2 = vld [vmem:[#allocation8] sm:$0xff]   ;;  %1871 = vmatprep.subr.bf16.mxu1 %v2068_v1  ;;  %v2073_v6 = vld [vmem:[#allocation8 + $0x8] sm:$0xff]   ;;  %v2076_v9 = vld [vmem:[#allocation8 + $0xd0] sm:$0xff]  }
  0x5c   :  { %v2070_v3 = vld [vmem:[#allocation8 + $0x80] sm:$0xff]   ;;  %1850 = vmatpush3.bf16.msra.mxu0 %v2069_v2  ;;  %v2074_v7 = vld [vmem:[#allocation8 + $0x88] sm:$0xff]   ;;  %v2077_v10 = vld [vmem:[#allocation8 + $0x10] sm:$0xff]  }
  0x5d   :  { %1872 = vmatpush3.bf16.msra.mxu1 %v2070_v3  ;;  %1851 = vmatprep.subr.bf16.mxu0 %v2071_v4  ;;  %v2078_v11 = vld [vmem:[#allocation8 + $0x90] sm:$0xff]   ;;  %v2079_v12 = vld [vmem:[#allocation8 + $0x58] sm:$0xff]   ;;  %v2083_v16 = vld [vmem:[#allocation8 + $0x60] sm:$0xff]  }
  0x5e   :  { %1873 = vmatprep.subr.bf16.mxu1 %v2072_v5  ;;  %v2080_v13 = vld [vmem:[#allocation8 + $0xd8] sm:$0xff]   ;;  %v2084_v17 = vld [vmem:[#allocation8 + $0xe0] sm:$0xff]   ;;  %v2087_v20 = vld [vmem:[#allocation8 + $0x68] sm:$0xff]  }
  0x5f   :  { %v2081_v14 = vld [vmem:[#allocation8 + $0x18] sm:$0xff]   ;;  %v2085_v18 = vld [vmem:[#allocation8 + $0x20] sm:$0xff]   ;;  %v2088_v21 = vld [vmem:[#allocation8 + $0xe8] sm:$0xff]  }
  0x60   :  { %1852 = vmatpush3.bf16.msra.mxu0 %v2073_v6  ;;  %v2082_v15 = vld [vmem:[#allocation8 + $0x98] sm:$0xff]   ;;  %v2086_v19 = vld [vmem:[#allocation8 + $0xa0] sm:$0xff]   ;;  %v2089_v22 = vld [vmem:[#allocation8 + $0x28] sm:$0xff]  }
  0x61   :  { %1874 = vmatpush3.bf16.msra.mxu1 %v2074_v7  ;;  %1853 = vmatprep.subr.bf16.mxu0 %v2075_v8  ;;  %v2090_v23 = vld [vmem:[#allocation8 + $0xa8] sm:$0xff]   ;;  %v2091_v24 = vld [vmem:[#allocation8 + $0x70] sm:$0xff]   ;;  %v2095_v28 = vld [vmem:[#allocation8 + $0x78] sm:$0xff]  }
  0x62   :  { %1875 = vmatprep.subr.bf16.mxu1 %v2076_v9  ;;  %v2092_v25 = vld [vmem:[#allocation8 + $0xf0] sm:$0xff]   ;;  %v2096_v29 = vld [vmem:[#allocation8 + $0xf8] sm:$0xff]   ;;  %v224_v32 = vld [vmem:[#allocation5] sm:$0xff] }
  0x63   :  { %v2093_v26 = vld [vmem:[#allocation8 + $0x30] sm:$0xff]   ;;  %v2097_v30 = vld [vmem:[#allocation8 + $0x38] sm:$0xff]   ;;  %v225_v33 = vld [vmem:[#allocation5 + $0x8] sm:$0xff]  ;;  %v1694_v34 = vcombine.low %v224_v32, %v224_v32  ;;  %v1695_v35 = vcombine.high %v224_v32, %v224_v32 }
  0x64   :  { %1854 = vmatpush3.bf16.msra.mxu0 %v2077_v10  ;;  %v2094_v27 = vld [vmem:[#allocation8 + $0xb0] sm:$0xff]   ;;  %v2098_v31 = vld [vmem:[#allocation8 + $0xb8] sm:$0xff]   ;;  %v1696_v36 = vcombine.low %v225_v33, %v225_v33  ;;  %v1697_v37 = vcombine.high %v225_v33, %v225_v33  ;;  %v2103_v38 = vld [vmem:[#allocation8 + $0x140] sm:$0xff]  }
  0x65   :  { %1876 = vmatpush3.bf16.msra.mxu1 %v2078_v11  ;;  %1855 = vmatprep.subr.bf16.mxu0 %v2079_v12  ;;  %v2104_v39 = vld [vmem:[#allocation8 + $0x1c0] sm:$0xff]   ;;  %v2107_v42 = vld [vmem:[#allocation8 + $0x148] sm:$0xff]   ;;  %v2111_v46 = vld [vmem:[#allocation8 + $0x150] sm:$0xff]  }
  0x66   :  { %1877 = vmatprep.subr.bf16.mxu1 %v2080_v13  ;;  %800 = vmatprep.mubr.bf16.mxu0 %v1695_v35  ;;  %v2105_v40 = vld [vmem:[#allocation8 + $0x100] sm:$0xff]   ;;  %v2108_v43 = vld [vmem:[#allocation8 + $0x1c8] sm:$0xff]   ;;  %v2112_v47 = vld [vmem:[#allocation8 + $0x1d0] sm:$0xff]  }
  0x67   :  { %840 = vmatprep.mubr.bf16.mxu1 %v1697_v37  ;;  %v2106_v41 = vld [vmem:[#allocation8 + $0x180] sm:$0xff]   ;;  %v2109_v44 = vld [vmem:[#allocation8 + $0x108] sm:$0xff]   ;;  %v2113_v48 = vld [vmem:[#allocation8 + $0x110] sm:$0xff]  }
  0x68   :  { %1856 = vmatpush3.bf16.msra.mxu0 %v2081_v14  ;;  %v2110_v45 = vld [vmem:[#allocation8 + $0x188] sm:$0xff]   ;;  %v2114_v49 = vld [vmem:[#allocation8 + $0x190] sm:$0xff]   ;;  %v2115_v50 = vld [vmem:[#allocation8 + $0x158] sm:$0xff]  }
  0x69   :  { %1878 = vmatpush3.bf16.msra.mxu1 %v2082_v15  ;;  %1857 = vmatprep.subr.bf16.mxu0 %v2083_v16  ;;  %v2116_v51 = vld [vmem:[#allocation8 + $0x1d8] sm:$0xff]   ;;  %v2119_v54 = vld [vmem:[#allocation8 + $0x160] sm:$0xff]   ;;  %v2123_v58 = vld [vmem:[#allocation8 + $0x168] sm:$0xff]  }
  0x6a   :  { %1879 = vmatprep.subr.bf16.mxu1 %v2084_v17  ;;  %v2117_v52 = vld [vmem:[#allocation8 + $0x118] sm:$0xff]   ;;  %v2120_v55 = vld [vmem:[#allocation8 + $0x1e0] sm:$0xff]   ;;  %v2124_v59 = vld [vmem:[#allocation8 + $0x1e8] sm:$0xff]  }
  0x6b   :  { %v2118_v53 = vld [vmem:[#allocation8 + $0x198] sm:$0xff]   ;;  %v2121_v56 = vld [vmem:[#allocation8 + $0x120] sm:$0xff]   ;;  %v2125_v60 = vld [vmem:[#allocation8 + $0x128] sm:$0xff]  }
  0x6c   :  { %1858 = vmatpush3.bf16.msra.mxu0 %v2085_v18  ;;  %v2122_v57 = vld [vmem:[#allocation8 + $0x1a0] sm:$0xff]   ;;  %v2126_v61 = vld [vmem:[#allocation8 + $0x1a8] sm:$0xff]   ;;  %v2127_v62 = vld [vmem:[#allocation8 + $0x170] sm:$0xff]  }
  0x6d   :  { %1880 = vmatpush3.bf16.msra.mxu1 %v2086_v19  ;;  %1859 = vmatprep.subr.bf16.mxu0 %v2087_v20  ;;  %v2128_v63 = vld [vmem:[#allocation8 + $0x1f0] sm:$0xff]   ;;  %v2131_v2 = vld [vmem:[#allocation8 + $0x178] sm:$0xff]   ;;  %v2139_v12 = vld [vmem:[#allocation7 + $0x40] sm:$0xff]  }
  0x6e   :  { %1881 = vmatprep.subr.bf16.mxu1 %v2088_v21  ;;  %v2129_v0 = vld [vmem:[#allocation8 + $0x130] sm:$0xff]   ;;  %v2132_v3 = vld [vmem:[#allocation8 + $0x1f8] sm:$0xff]   ;;  %v2140_v13 = vld [vmem:[#allocation7 + $0xc0] sm:$0xff]  }
  0x6f   :  { %v2130_v1 = vld [vmem:[#allocation8 + $0x1b0] sm:$0xff]   ;;  %v2133_v4 = vld [vmem:[#allocation8 + $0x138] sm:$0xff]   ;;  %v2141_v14 = vld [vmem:[#allocation7] sm:$0xff]  }
  0x70   :  { %1860 = vmatpush3.bf16.msra.mxu0 %v2089_v22  ;;  %v2134_v5 = vld [vmem:[#allocation8 + $0x1b8] sm:$0xff]   ;;  %v226_v6 = vld [vmem:[#allocation5 + $0x10] sm:$0xff]  ;;  %v2142_v15 = vld [vmem:[#allocation7 + $0x80] sm:$0xff]  }
  0x71   :  { %1882 = vmatpush3.bf16.msra.mxu1 %v2090_v23  ;;  %1861 = vmatprep.subr.bf16.mxu0 %v2091_v24  ;;  %v1698_v7 = vcombine.low %v226_v6, %v226_v6  ;;  %v1699_v8 = vcombine.high %v226_v6, %v226_v6  ;;  %v227_v9 = vld [vmem:[#allocation5 + $0x18] sm:$0xff]  ;;  %v2143_v16 = vld [vmem:[#allocation7 + $0x48] sm:$0xff]   ;;  %v2147_v20 = vld [vmem:[#allocation7 + $0x50] sm:$0xff]  }
  0x72   :  { %1883 = vmatprep.subr.bf16.mxu1 %v2092_v25  ;;  %v1700_v10 = vcombine.low %v227_v9, %v227_v9  ;;  %v1701_v11 = vcombine.high %v227_v9, %v227_v9  ;;  %v2144_v17 = vld [vmem:[#allocation7 + $0xc8] sm:$0xff]   ;;  %v2148_v21 = vld [vmem:[#allocation7 + $0xd0] sm:$0xff]   ;;  %v2151_v24 = vld [vmem:[#allocation7 + $0x58] sm:$0xff]  }
  0x73   :  { %v2145_v18 = vld [vmem:[#allocation7 + $0x8] sm:$0xff]   ;;  %v2149_v22 = vld [vmem:[#allocation7 + $0x10] sm:$0xff]   ;;  %v2152_v25 = vld [vmem:[#allocation7 + $0xd8] sm:$0xff]  }
  0x74   :  { %1862 = vmatpush3.bf16.msra.mxu0 %v2093_v26  ;;  %v2146_v19 = vld [vmem:[#allocation7 + $0x88] sm:$0xff]   ;;  %v2150_v23 = vld [vmem:[#allocation7 + $0x90] sm:$0xff]   ;;  %v2153_v26 = vld [vmem:[#allocation7 + $0x18] sm:$0xff]  }
  0x75   :  { %1884 = vmatpush3.bf16.msra.mxu1 %v2094_v27  ;;  %1863 = vmatprep.subr.bf16.mxu0 %v2095_v28  ;;  %v2154_v27 = vld [vmem:[#allocation7 + $0x98] sm:$0xff]   ;;  %v2155_v28 = vld [vmem:[#allocation7 + $0x60] sm:$0xff]   ;;  %v2159_v32 = vld [vmem:[#allocation7 + $0x68] sm:$0xff]  }
  0x76   :  { %1885 = vmatprep.subr.bf16.mxu1 %v2096_v29  ;;  %v2156_v29 = vld [vmem:[#allocation7 + $0xe0] sm:$0xff]   ;;  %v2160_v33 = vld [vmem:[#allocation7 + $0xe8] sm:$0xff]   ;;  %v2164_v37 = vld [vmem:[#allocation7 + $0xf0] sm:$0xff]  }
  0x77   :  { %v2162_v35 = vld [vmem:[#allocation7 + $0xa8] sm:$0xff]  }
  0x78   :  { %1864 = vmatpush3.bf16.msra.mxu0 %v2097_v30  ;;  %v2157_v30 = vld [vmem:[#allocation7 + $0x20] sm:$0xff]   ;;  %v2195_v6 = vld [vmem:[#allocation7 + $0x168] sm:$0xff]  }
  0x79   :  { %1886 = vmatpush3.bf16.msra.mxu1 %v2098_v31  ;;  %1893 = vmatprep.subr.bf16.mxu0 %v2103_v38  ;;  %v2158_v31 = vld [vmem:[#allocation7 + $0xa0] sm:$0xff]   ;;  %v2165_v38 = vld [vmem:[#allocation7 + $0x30] sm:$0xff]   ;;  %v2198_v9 = vld [vmem:[#allocation7 + $0x1a8] sm:$0xff]  }
  0x7a   :  { %1915 = vmatprep.subr.bf16.mxu1 %v2104_v39  ;;  %v2166_v39 = vld [vmem:[#allocation7 + $0xb0] sm:$0xff]  }
  0x7b   :  { %801 = vmatmul.mubr.bf16.vlgmr.msra.gmra.mrb[0].mxu0 %v1694_v34  ;;  %v2161_v34 = vld [vmem:[#allocation7 + $0x28] sm:$0xff]  }
  0x7c   :  { %841 = vmatmul.mubr.bf16.vlgmr.msra.gmra.mrb[0].mxu1 %v1696_v36  ;;  %1894 = vmatpush3.bf16.msra.mxu0 %v2105_v40  ;;  %v2163_v36 = vld [vmem:[#allocation7 + $0x70] sm:$0xff]   ;;  %v2167_v40 = vld [vmem:[#allocation7 + $0x78] sm:$0xff]  }
  0x7d   :  { %1916 = vmatpush3.bf16.msra.mxu1 %v2106_v41  ;;  %1895 = vmatprep.subr.bf16.mxu0 %v2107_v42  ;;  %v2168_v41 = vld [vmem:[#allocation7 + $0xf8] sm:$0xff]  }
  0x7e   :  { %1917 = vmatprep.subr.bf16.mxu1 %v2108_v43  ;;  %880 = vmatprep.mubr.bf16.mxu0 %v1699_v8  ;;  %v2169_v42 = vld [vmem:[#allocation7 + $0x38] sm:$0xff]   ;;  %v2197_v8 = vld [vmem:[#allocation7 + $0x128] sm:$0xff]  }
  0x7f   :  { %920 = vmatprep.mubr.bf16.mxu1 %v1701_v11  ;;  %v2170_v43 = vld [vmem:[#allocation7 + $0xb8] sm:$0xff]   ;;  %v2200_v11 = vld [vmem:[#allocation7 + $0x1f0] sm:$0xff]  }
  0x80   :  { %1896 = vmatpush3.bf16.msra.mxu0 %v2109_v44  ;;  %v92_v44 = vld [vmem:[#allocation2] sm:$0xff] }
  0x81   :  { %1918 = vmatpush3.bf16.msra.mxu1 %v2110_v45  ;;  %1897 = vmatprep.subr.bf16.mxu0 %v2111_v46  ;;  %v93_v45 = vld [vmem:[#allocation2 + $0x8] sm:$0xff]  ;;  %v1766_v46 = vcombine.low %v92_v44, %v92_v44 }
  0x82   :  { %1919 = vmatprep.subr.bf16.mxu1 %v2112_v47  ;;  %v1767_v47 = vcombine.high %v92_v44, %v92_v44 }
  0x84   :  { %1898 = vmatpush3.bf16.msra.mxu0 %v2113_v48  ;;  %v1768_v48 = vcombine.low %v93_v45, %v93_v45 }
  0x85   :  { %1920 = vmatpush3.bf16.msra.mxu1 %v2114_v49  ;;  %1899 = vmatprep.subr.bf16.mxu0 %v2115_v50  ;;  %v1769_v49 = vcombine.high %v93_v45, %v93_v45  ;;  %v2175_v50 = vld [vmem:[#allocation7 + $0x140] sm:$0xff]  }
  0x86   :  { %1921 = vmatprep.subr.bf16.mxu1 %v2116_v51  ;;  %v2176_v51 = vld [vmem:[#allocation7 + $0x1c0] sm:$0xff]  }
  0x88   :  { %1900 = vmatpush3.bf16.msra.mxu0 %v2117_v52  ;;  %v2177_v52 = vld [vmem:[#allocation7 + $0x100] sm:$0xff]  }
  0x89   :  { %1922 = vmatpush3.bf16.msra.mxu1 %v2118_v53  ;;  %1901 = vmatprep.subr.bf16.mxu0 %v2119_v54  ;;  %v2178_v53 = vld [vmem:[#allocation7 + $0x180] sm:$0xff]   ;;  %v2179_v54 = vld [vmem:[#allocation7 + $0x148] sm:$0xff]  }
  0x8a   :  { %1923 = vmatprep.subr.bf16.mxu1 %v2120_v55  ;;  %v2180_v55 = vld [vmem:[#allocation7 + $0x1c8] sm:$0xff]  }
  0x8c   :  { %1902 = vmatpush3.bf16.msra.mxu0 %v2121_v56  ;;  %v2181_v56 = vld [vmem:[#allocation7 + $0x108] sm:$0xff]  }
  0x8d   :  { %1924 = vmatpush3.bf16.msra.mxu1 %v2122_v57  ;;  %1903 = vmatprep.subr.bf16.mxu0 %v2123_v58  ;;  %v2182_v57 = vld [vmem:[#allocation7 + $0x188] sm:$0xff]   ;;  %v2183_v58 = vld [vmem:[#allocation7 + $0x150] sm:$0xff]  }
  0x8e   :  { %1925 = vmatprep.subr.bf16.mxu1 %v2124_v59  ;;  %v2184_v59 = vld [vmem:[#allocation7 + $0x1d0] sm:$0xff]  }
  0x90   :  { %1904 = vmatpush3.bf16.msra.mxu0 %v2125_v60  ;;  %v2185_v60 = vld [vmem:[#allocation7 + $0x110] sm:$0xff]  }
  0x91   :  { %1926 = vmatpush3.bf16.msra.mxu1 %v2126_v61  ;;  %1905 = vmatprep.subr.bf16.mxu0 %v2127_v62  ;;  %v2186_v61 = vld [vmem:[#allocation7 + $0x190] sm:$0xff]   ;;  %v2187_v62 = vld [vmem:[#allocation7 + $0x158] sm:$0xff]  }
  0x92   :  { %1927 = vmatprep.subr.bf16.mxu1 %v2128_v63  ;;  %v2188_v63 = vld [vmem:[#allocation7 + $0x1d8] sm:$0xff]  }
  0x94   :  { %1906 = vmatpush3.bf16.msra.mxu0 %v2129_v0  ;;  %v2189_v0 = vld [vmem:[#allocation7 + $0x118] sm:$0xff]  }
  0x95   :  { %1928 = vmatpush3.bf16.msra.mxu1 %v2130_v1  ;;  %1907 = vmatprep.subr.bf16.mxu0 %v2131_v2  ;;  %v2190_v1 = vld [vmem:[#allocation7 + $0x198] sm:$0xff]   ;;  %v2191_v2 = vld [vmem:[#allocation7 + $0x160] sm:$0xff]  }
  0x96   :  { %1929 = vmatprep.subr.bf16.mxu1 %v2132_v3  ;;  %v2192_v3 = vld [vmem:[#allocation7 + $0x1e0] sm:$0xff]  }
  0x98   :  { %1908 = vmatpush3.bf16.msra.mxu0 %v2133_v4  ;;  %v2193_v4 = vld [vmem:[#allocation7 + $0x120] sm:$0xff]  }
  0x99   :  { %1930 = vmatpush3.bf16.msra.mxu1 %v2134_v5  ;;  %1937 = vmatprep.subr.bf16.mxu0 %v2139_v12  ;;  %v2194_v5 = vld [vmem:[#allocation7 + $0x1a0] sm:$0xff]   ;;  %v2201_v12 = vld [vmem:[#allocation7 + $0x130] sm:$0xff]  }
  0x9a   :  { %1959 = vmatprep.subr.bf16.mxu1 %v2140_v13  ;;  %v2202_v13 = vld [vmem:[#allocation7 + $0x1b0] sm:$0xff]  }
  0x9b   :  { %881 = vmatmul.mubr.bf16.vlgmr.msra.gmra.mrb[4].mxu0 %v1698_v7  ;;  %v2196_v7 = vld [vmem:[#allocation7 + $0x1e8] sm:$0xff]  }
  0x9c   :  { %921 = vmatmul.mubr.bf16.vlgmr.msra.gmra.mrb[4].mxu1 %v1700_v10  ;;  %1938 = vmatpush3.bf16.msra.mxu0 %v2141_v14  ;;  %v2199_v10 = vld [vmem:[#allocation7 + $0x170] sm:$0xff]   ;;  %v2203_v14 = vld [vmem:[#allocation7 + $0x178] sm:$0xff]  }
  0x9d   :  { %1960 = vmatpush3.bf16.msra.mxu1 %v2142_v15  ;;  %1939 = vmatprep.subr.bf16.mxu0 %v2143_v16  ;;  %v2204_v15 = vld [vmem:[#allocation7 + $0x1f8] sm:$0xff]  }
  0x9e   :  { %1961 = vmatprep.subr.bf16.mxu1 %v2144_v17  ;;  %1372 = vmatprep.mubr.bf16.mxu0 %v1767_v47  ;;  %v2205_v16 = vld [vmem:[#allocation7 + $0x138] sm:$0xff]  }
  0x9f   :  { %1412 = vmatprep.mubr.bf16.mxu1 %v1769_v49  ;;  %v2206_v17 = vld [vmem:[#allocation7 + $0x1b8] sm:$0xff]  }
  0xa0   :  { %1940 = vmatpush3.bf16.msra.mxu0 %v2145_v18  ;;  %v94_v18 = vld [vmem:[#allocation2 + $0x10] sm:$0xff] }
  0xa1   :  { %1962 = vmatpush3.bf16.msra.mxu1 %v2146_v19  ;;  %1941 = vmatprep.subr.bf16.mxu0 %v2147_v20  ;;  %v95_v19 = vld [vmem:[#allocation2 + $0x18] sm:$0xff]  ;;  %v1770_v20 = vcombine.low %v94_v18, %v94_v18 }
  0xa2   :  { %1963 = vmatprep.subr.bf16.mxu1 %v2148_v21  ;;  %v1771_v21 = vcombine.high %v94_v18, %v94_v18 }
  0xa4   :  { %1942 = vmatpush3.bf16.msra.mxu0 %v2149_v22  ;;  %v1772_v22 = vcombine.low %v95_v19, %v95_v19 }
  0xa5   :  { %1964 = vmatpush3.bf16.msra.mxu1 %v2150_v23  ;;  %1943 = vmatprep.subr.bf16.mxu0 %v2151_v24  ;;  %v1773_v23 = vcombine.high %v95_v19, %v95_v19  ;;  %v2211_v24 = vld [vmem:[#allocation10] sm:$0xff]  }
  0xa6   :  { %1965 = vmatprep.subr.bf16.mxu1 %v2152_v25  ;;  %v2372_v25 = vmov 0.0  }
  0xa8   :  { %1944 = vmatpush3.bf16.msra.mxu0 %v2153_v26  ;;  %v2212_v26 = vld [vmem:[#allocation10 + $0x8] sm:$0xff]  }
  0xa9   :  { %1966 = vmatpush3.bf16.msra.mxu1 %v2154_v27  ;;  %1945 = vmatprep.subr.bf16.mxu0 %v2155_v28  ;;  %v2213_v27 = vld [vmem:[#allocation10 + $0x10] sm:$0xff]   ;;  %v2214_v28 = vld [vmem:[#allocation10 + $0x18] sm:$0xff]  }
  0xaa   :  { %1967 = vmatprep.subr.bf16.mxu1 %v2156_v29  ;;  %v2215_v29 = vld [vmem:[#allocation10 + $0x20] sm:$0xff]  }
  0xac   :  { %1946 = vmatpush3.bf16.msra.mxu0 %v2157_v30  ;;  %v2216_v30 = vld [vmem:[#allocation10 + $0x28] sm:$0xff]  }
  0xad   :  { %1968 = vmatpush3.bf16.msra.mxu1 %v2158_v31  ;;  %1947 = vmatprep.subr.bf16.mxu0 %v2159_v32  ;;  %v2217_v31 = vld [vmem:[#allocation10 + $0x30] sm:$0xff]   ;;  %v2218_v32 = vld [vmem:[#allocation10 + $0x38] sm:$0xff]  }
  0xae   :  { %1969 = vmatprep.subr.bf16.mxu1 %v2160_v33 }
  0xb0   :  { %1948 = vmatpush3.bf16.msra.mxu0 %v2161_v34 }
  0xb1   :  { %1970 = vmatpush3.bf16.msra.mxu1 %v2162_v35  ;;  %1949 = vmatprep.subr.bf16.mxu0 %v2163_v36 }
  0xb2   :  { %1971 = vmatprep.subr.bf16.mxu1 %v2164_v37 }
  0xb4   :  { %1950 = vmatpush3.bf16.msra.mxu0 %v2165_v38 }
  0xb5   :  { %1972 = vmatpush3.bf16.msra.mxu1 %v2166_v39  ;;  %1951 = vmatprep.subr.bf16.mxu0 %v2167_v40 }
  0xb6   :  { %1973 = vmatprep.subr.bf16.mxu1 %v2168_v41 }
  0xb8   :  { %1952 = vmatpush3.bf16.msra.mxu0 %v2169_v42 }
  0xb9   :  { %1974 = vmatpush3.bf16.msra.mxu1 %v2170_v43  ;;  %1981 = vmatprep.subr.bf16.mxu0 %v2175_v50 }
  0xba   :  { %2003 = vmatprep.subr.bf16.mxu1 %v2176_v51 }
  0xbb   :  { %1373 = vmatmul.mubr.bf16.vlgmr.msra.gmra.mrb[8].mxu0 %v1766_v46 }
  0xbc   :  { %1413 = vmatmul.mubr.bf16.vlgmr.msra.gmra.mrb[8].mxu1 %v1768_v48  ;;  %1982 = vmatpush3.bf16.msra.mxu0 %v2177_v52 }
  0xbd   :  { %2004 = vmatpush3.bf16.msra.mxu1 %v2178_v53  ;;  %1983 = vmatprep.subr.bf16.mxu0 %v2179_v54 }
  0xbe   :  { %2005 = vmatprep.subr.bf16.mxu1 %v2180_v55  ;;  %1452 = vmatprep.mubr.bf16.mxu0 %v1771_v21 }
  0xbf   :  { %1492 = vmatprep.mubr.bf16.mxu1 %v1773_v23 }
  0xc0   :  { %1984 = vmatpush3.bf16.msra.mxu0 %v2181_v56 }
  0xc1   :  { %2006 = vmatpush3.bf16.msra.mxu1 %v2182_v57  ;;  %1985 = vmatprep.subr.bf16.mxu0 %v2183_v58 }
  0xc2   :  { %2007 = vmatprep.subr.bf16.mxu1 %v2184_v59 }
  0xc4   :  { %1986 = vmatpush3.bf16.msra.mxu0 %v2185_v60 }
  0xc5   :  { %2008 = vmatpush3.bf16.msra.mxu1 %v2186_v61  ;;  %1987 = vmatprep.subr.bf16.mxu0 %v2187_v62 }
  0xc6   :  { %2009 = vmatprep.subr.bf16.mxu1 %v2188_v63 }
  0xc8   :  { %1988 = vmatpush3.bf16.msra.mxu0 %v2189_v0 }
  0xc9   :  { %2010 = vmatpush3.bf16.msra.mxu1 %v2190_v1  ;;  %1989 = vmatprep.subr.bf16.mxu0 %v2191_v2 }
  0xca   :  { %2011 = vmatprep.subr.bf16.mxu1 %v2192_v3 }
  0xcc   :  { %1990 = vmatpush3.bf16.msra.mxu0 %v2193_v4 }
  0xcd   :  { %2012 = vmatpush3.bf16.msra.mxu1 %v2194_v5  ;;  %1991 = vmatprep.subr.bf16.mxu0 %v2195_v6 }
  0xce   :  { %2013 = vmatprep.subr.bf16.mxu1 %v2196_v7 }
  0xd0   :  { %1992 = vmatpush3.bf16.msra.mxu0 %v2197_v8 }
  0xd1   :  { %2014 = vmatpush3.bf16.msra.mxu1 %v2198_v9  ;;  %1993 = vmatprep.subr.bf16.mxu0 %v2199_v10 }
  0xd2   :  { %2015 = vmatprep.subr.bf16.mxu1 %v2200_v11 }
  0xd4   :  { %1994 = vmatpush3.bf16.msra.mxu0 %v2201_v12 }
  0xd5   :  { %2016 = vmatpush3.bf16.msra.mxu1 %v2202_v13  ;;  %1995 = vmatprep.subr.bf16.mxu0 %v2203_v14 }
  0xd6   :  { %2017 = vmatprep.subr.bf16.mxu1 %v2204_v15  ;;  %v1838_v15 = vld [vmem:[%s2526_s4] ss:$0 sm:$0xff]  ;;  %s2375_s4 = smov [#allocation11]  }
  0xd8   :  { %1996 = vmatpush3.bf16.msra.mxu0 %v2205_v16 }
  0xd9   :  { %2018 = vmatpush3.bf16.msra.mxu1 %v2206_v17  ;;  %2034 = vmatprep.subr.bf16.mxu0 %v2372_v25 }
  0xdb   :  { %1453 = vmatmul.mubr.bf16.vlgmr.msra.gmra.mrb[12].mxu0 %v1770_v20  ;;  %v1621_v20 = vlaneseq }
  0xdc   :  { %1493 = vmatmul.mubr.bf16.vlgmr.msra.gmra.mrb[12].mxu1 %v1772_v22  ;;  %2035 = vmatpush3.bf16.msra.mxu0 %v2211_v24  ;;  %v1839_v22 = vld [vmem:[%s2528_s6] ss:$0 sm:$0xff]  ;;  %s1683_s6 = sshll.u32 %s2375_s4, 4  ;;  %s1684_s6 = int_to_ptr.vmem [resolvable:$true] %s1683_s6 }
  0xdd   :  { %2036 = vmatprep.subr.bf16.mxu0 %v2372_v25  ;;  %2050 = vmatprep.mubr.msk.bf16.mxu0 %vm2373_vm0, %v2372_v25  ;;  %v2488_v21 = vand.u32 127, %v1621_v20  ;;  %s2335_s14 = scalar_lea.vmem %s1684_s6, 128  ;;  %p2340_p13 = scmp.lt.s32.totalorder %s1684_s6, %s1684_s6 }
  0xde   :  { %p2336_p12 = scmp.ne.s32.totalorder %s1684_s6, %s2335_s14  ;;  %p2341_p0 = scmp.lt.s32.totalorder %s2335_s14, %s2335_s14 }
  0xdf   :  { %vm1623_vm1 = vcmp.ge.s32.totalorder %v2488_v21, 1  ;;  %vm1624_vm2 = vcmp.lt.s32.totalorder %v2488_v21, 5  ;;  %vm1666_vm7 = vcmp.eq.s32.totalorder %v2488_v21, 3  ;;  %vm1664_vm8 = vcmp.eq.s32.totalorder %v2488_v21, 2 }
  0xe0   :  { %2037 = vmatpush3.bf16.msra.mxu0 %v2212_v26  ;;  %vm2495_vm3 = vmand %vm1623_vm1, %vm1624_vm2  ;;  %vm1663_vm9 = vcmp.eq.s32.totalorder %v2488_v21, 1  ;;  %vm1662_vm10 = vcmp.eq.s32.totalorder %v2488_v21, 0  ;;  %p2342_p1 = por %p2341_p0, %p2340_p13 }
  0xe1   :  { %2038 = vmatprep.subr.bf16.mxu0 %v2372_v25 }
  0xe2   :  { %p2343_p2 = pnand %p2342_p1, %p2336_p12 }
  0xe4   :  { %2039 = vmatpush3.bf16.msra.mxu0 %v2213_v27 }
  0xe5   :  { %2040 = vmatprep.subr.bf16.mxu0 %v2372_v25 }
  0xe8   :  { %2041 = vmatpush3.bf16.msra.mxu0 %v2214_v28 }
  0xe9   :  { %2042 = vmatprep.subr.bf16.mxu0 %v2372_v25 }
  0xec   :  { %2043 = vmatpush3.bf16.msra.mxu0 %v2215_v29 }
  0xed   :  { %2044 = vmatprep.subr.bf16.mxu0 %v2372_v25 }
  0xf0   :  { %2045 = vmatpush3.bf16.msra.mxu0 %v2216_v30 }
  0xf1   :  { %2046 = vmatprep.subr.bf16.mxu0 %v2372_v25 }
  0xf4   :  { %2047 = vmatpush3.bf16.msra.mxu0 %v2217_v31 }
  0xf5   :  { %2048 = vmatprep.subr.bf16.mxu0 %v2372_v25 }
  0xf8   :  { %2049 = vmatpush3.bf16.msra.mxu0 %v2218_v32  ;;  %v1848_v32 = vadd.s32 4294967295, %v2488_v21 }
 0x14e   :  { %v1865_v33 = vpop.f32.mrb[0].mxu0 }
 0x14f   :  { %v1887_v34 = vpop.f32.mrb[0].mxu1  ;;  %v1866_v35 = vpop.f32.mrb[1].mxu0 }
 0x150   :  { %v1888_v36 = vpop.f32.mrb[1].mxu1  ;;  %v1867_v37 = vadd.f32 %v1866_v35, %v1865_v33  ;;  %v1868_v39 = vpop.f32.mrb[2].mxu0 }
 0x151   :  { %v1889_v38 = vadd.f32 %v1888_v36, %v1887_v34  ;;  %v1890_v40 = vpop.f32.mrb[2].mxu1  ;;  %v1869_v41 = vpop.f32.mrb[3].mxu0 }
 0x152   :  { %v1891_v42 = vpop.f32.mrb[3].mxu1  ;;  %v2374_v40 = vmov 0  }
 0x153   :  { %v843_v43 = vadd.f32 %v1889_v38, %v1867_v37  ;;  %2065 = vset.pattern.permute.xlu1 %v2374_v40  ;;  %2066 = vset.pattern.permute.xlu0 %v2374_v40 }
 0x16e   :  { %v1909_v44 = vpop.f32.mrb[4].mxu0 }
 0x16f   :  { %v1931_v45 = vpop.f32.mrb[4].mxu1  ;;  %v1910_v46 = vpop.f32.mrb[5].mxu0 }
 0x170   :  { %v1932_v47 = vpop.f32.mrb[5].mxu1  ;;  %v1911_v48 = vadd.f32 %v1910_v46, %v1909_v44  ;;  %v1912_v50 = vpop.f32.mrb[6].mxu0 }
 0x171   :  { %v1933_v49 = vadd.f32 %v1932_v47, %v1931_v45  ;;  %v1934_v51 = vpop.f32.mrb[6].mxu1  ;;  %v1913_v52 = vpop.f32.mrb[7].mxu0 }
 0x172   :  { %v1935_v53 = vpop.f32.mrb[7].mxu1  ;;  %v883_v54 = vadd.f32 %v1911_v48, %v843_v43 }
 0x174   :  { %v923_v55 = vadd.f32 %v1933_v49, %v883_v54 }
 0x18e   :  { %v1953_v56 = vpop.f32.mrb[8].mxu0 }
 0x18f   :  { %v1975_v57 = vpop.f32.mrb[8].mxu1  ;;  %v1954_v58 = vpop.f32.mrb[9].mxu0 }
 0x190   :  { %v1955_v59 = vadd.f32 %v1954_v58, %v1953_v56  ;;  %v1976_v60 = vpop.f32.mrb[9].mxu1  ;;  %v1956_v61 = vpop.f32.mrb[10].mxu0 }
 0x191   :  { %v1977_v62 = vadd.f32 %v1976_v60, %v1975_v57  ;;  %v1978_v63 = vpop.f32.mrb[10].mxu1  ;;  %v1957_v0 = vpop.f32.mrb[11].mxu0 }
 0x192   :  { %v1375_v1 = vadd.f32 %v1955_v59, %v923_v55  ;;  %v1979_v2 = vpop.f32.mrb[11].mxu1 }
 0x194   :  { %v1415_v3 = vadd.f32 %v1977_v62, %v1375_v1 }
 0x1ae   :  { %v1997_v4 = vpop.f32.mrb[12].mxu0 }
 0x1af   :  { %v2019_v5 = vpop.f32.mrb[12].mxu1  ;;  %v1998_v6 = vpop.f32.mrb[13].mxu0 }
 0x1b0   :  { %v1999_v7 = vadd.f32 %v1998_v6, %v1997_v4  ;;  %v2020_v8 = vpop.f32.mrb[13].mxu1  ;;  %v2000_v9 = vpop.f32.mrb[14].mxu0 }
 0x1b1   :  { %v2021_v10 = vadd.f32 %v2020_v8, %v2019_v5  ;;  %v2022_v11 = vpop.f32.mrb[14].mxu1  ;;  %v2001_v12 = vpop.f32.mrb[15].mxu0 }
 0x1b2   :  { %v1455_v13 = vadd.f32 %v1999_v7, %v1415_v3  ;;  %v2023_v14 = vpop.f32.mrb[15].mxu1 }
 0x1b4   :  { %v1495_v16 = vadd.f32 %v2021_v10, %v1455_v13 }
 0x1b6   :  { %v1507_v17 = vadd.f32 %v1838_v15, %v1495_v16 }
 0x1b8   :  { %v1508_v18 = vmax.f32 %v1507_v17, 0.0 }
 0x1ba   :  { %v1509_v19 = vpack.c.bf16 %v1508_v18, %v1508_v18 }
 0x1bc   :  { %2051 = vmatmul.mubr.bf16.vlgmr.msra.gmra.mrb[16].mxu0 %v1509_v19 }
 0x28f   :  { %v1615_v23 = vpop.f32.mrb[16].mxu0 }
 0x290   :  { %v1616_v25 = vadd.f32 %v1839_v22, %v1615_v23  ;;  %v2052_v26 = vpop.f32.mrb[17].mxu0 }
 0x291   :  { %v1618_v27 = vpop.f32.mrb[18].mxu0 }
 0x292   :  { %v2053_v28 = vpop.f32.mrb[19].mxu0  ;;  %v1626_v29 = vsel %vm2495_vm3, %v1616_v25, -1e+30 }
 0x293   :  { %1627 = vmax.xlane.f32.xlu0 %v1626_v29 }
 0x320   :  { %v1628_v30 = vpop.xlane.xlu0 %1627 }
 0x321   :  { %v1629_v31 = vsub.f32 %v1626_v29, %v1628_v30 }
 0x323   :  { %v1630_v33 = vmul.f32 1.442695, %v1629_v31  ;;  %vm1645_vm4 = vcmp.eq.f32.partialorder %v1629_v31, 0.0 }
 0x324   :  { %vm1646_vm5 = vmand %vm1645_vm4, %vm2495_vm3 }
 0x325   :  { %2219 = vpow2.f32 %v1630_v33  ;;  %v1647_v34 = vsel %vm1646_vm5, %v1848_v32, 128 }
 0x326   :  { %v1649_v35 = vshra.s32 %v1647_v34, 16  ;;  %v1648_v41 = vand.u32 65535, %v1647_v34 }
 0x328   :  { %v1651_v36 = vcvt.s32.f32 %v1649_v35  ;;  %v1650_v43 = vcvt.s32.f32 %v1648_v41 }
 0x32a   :  { %1652 = vmin.xlane.f32.xlu0 %v1651_v36 }
 0x32f   :  { %v2220_v37 = vpop.eup %2219 }
 0x330   :  { %1632 = vadd.xlane.f32.xlu1 %v2220_v37  ;;  %v1637_v38 = vmul.f32 %v2220_v37, %v1629_v31 }
 0x332   :  { %v1638_v39 = vsel %vm2495_vm3, %v1637_v38, 0.0 }
 0x333   :  { %1639 = vadd.xlane.f32.xlu0 %v1638_v39 }
 0x3b7   :  { %v1653_v42 = vpop.xlane.xlu0 %1652 }
 0x3b8   :  { %vm1654_vm6 = vcmp.eq.f32.partialorder %v1651_v36, %v1653_v42  ;;  %v1659_v48 = vcvt.f32.s32 %v1653_v42 }
 0x3b9   :  { %v1655_v44 = vsel %vm1654_vm6, %v1650_v43, inf }
 0x3ba   :  { %1656 = vmin.xlane.f32.xlu1 %v1655_v44  ;;  %v1660_v53 = vshll.u32 %v1659_v48, 16 }
 0x3bd   :  { %v1633_v45 = vpop.xlane.xlu1 %1632 }
 0x3be   :  { %2221 = vlog2.f32 %v1633_v45 }
 0x3bf   :  { %2223 = vrcp.f32 %v1633_v45 }
 0x3c0   :  { %v1640_v49 = vpop.xlane.xlu0 %1639 }
 0x3c8   :  { %v2222_v46 = vpop.eup %2221 }
 0x3c9   :  { %v2224_v47 = vpop.eup %2223  ;;  %v1635_v50 = vmul.f32 0.6931472, %v2222_v46 }
 0x3ca   :  { %v1642_v51 = vmul.f32 %v2224_v47, %v1640_v49 }
 0x3cb   :  { %1672 = vperm.xlu1 %2065, %v1616_v25   ;;  %v1636_v58 = vsub.f32 0.0, %v1635_v50 }
 0x3cc   :  { %v1643_v55 = vsub.f32 %v1635_v50, %v1642_v51 }
 0x3ce   :  { %v1667_v59 = vsel %vm1666_vm7, %v1643_v55, 0.0 }
 0x447   :  { %v1657_v52 = vpop.xlane.xlu1 %1656 }
 0x448   :  { %v1658_v54 = vcvt.f32.s32 %v1657_v52 }
 0x44a   :  { %v1661_v56 = vadd.s32 %v1660_v53, %v1658_v54 }
 0x44b   :  { %v1673_v61 = vpop.permute.xlu1 %1672 }
 0x44c   :  { %v1665_v57 = vcvt.s32.f32 %v1661_v56 }
 0x44e   :  { %v1668_v60 = vsel %vm1664_vm8, %v1665_v57, %v1667_v59 }
 0x44f   :  { %v1669_v62 = vsel %vm1663_vm9, %v1636_v58, %v1668_v60 }
 0x450   :  { %v1675_v63 = vsel %vm1662_vm10, %v1673_v61, %v1669_v62 }
 0x451   :  { %1676 = vst [vmem:[#allocation11] sm:$0xff] %v1675_v63 }
 0x452   :  { %2346 = shalt.err (!%p2343_p2)
}
 0x453   :  { %s2347_s18 = scalar_lea.hbm %s2529_s7, 128 }
 0x454   :  { %p2348_p3 = scmp.ne.s32.totalorder %s2529_s7, %s2347_s18  ;;  %p2351_p4 = scmp.lt.u32.totalorder %s2347_s18, %s2529_s7 }
 0x456   :  { %p2353_p5 = pnand %p2351_p4, %p2348_p3 }
 0x458   :  { %2356 = shalt.err (!%p2353_p5)
}
 0x459   :  { %1686 = dma.vmem_to_hbm [thread:$0]  %s1684_s6, 128, %s2529_s7, [#allocation4]  }
 0x45a   :  { %2363 = dma.done.wait [#allocation4], 128  }
 0x45b   :  { %2364 = vsyncadd [#allocation4], 4294967168 }
 0x45c   :  { %1690 = vsyncpa [#allocation3], 1 }
 0x45d   :  { %1691 = vsyncpa [#allocation6], 1 }
 0x45e   :  { %1692 = vsyncpa [#allocation9], 1 }
 0x45f   :  { %1693 = vsyncpa [#allocation4], 1 }

</bundles_post_ra>
